<compile_context>
chip_gen: v6e
topology: v6e:2x2x1
jax: 0.10.0
libtpu: 0.0.40
codegen_flags: <defaults>
</compile_context>

<pallas_src>
import functools

import jax
import jax.numpy as jnp
from jax import lax
from jax.experimental import pallas as pl
from jax.experimental.pallas import tpu as pltpu

GAMMA = 12.0
MU = 0.8
ALPHA = 2.0


def _round_up(x, m):
    return (x + m - 1) // m * m


def _sublane_granule(dtype):
    # f32 -> 8 rows, bf16/f16 -> 16, int8/fp8/bool -> 32 (sub-32-bit dtypes
    # pack along sublanes, so row-block granularity must follow the packing).
    bits = jnp.dtype(dtype).itemsize * 8
    return max(8, 256 // bits)


def _chip_config():
    """Returns (multi_tensorcore, per-block VMEM byte budget, vmem_limit)."""
    try:
        kind = jax.devices()[0].device_kind.lower()
    except Exception:  # pragma: no cover - e.g. no backend during tracing tests
        kind = ""
    multi_tc = ("v7" in kind) or ("v5p" in kind) or ("v4" in kind)
    if "v7" in kind:
        # 64 MiB VMEM per TensorCore: smaller blocks, modest scoped limit.
        return multi_tc, 2 * 1024 * 1024, 40 * 1024 * 1024
    if ("v2" in kind) or ("v3" in kind):
        # Old gens with small VMEM: tiny blocks, leave the default limit.
        return multi_tc, 1 * 1024 * 1024, None
    # v4 / v5e / v5p / v6e: 128 MiB VMEM, HBM-bound -> big tiles, raised limit.
    return multi_tc, 4 * 1024 * 1024, 96 * 1024 * 1024


def _eqlv2_sums_kernel(pred_ref, target_ref,
                       sb_ref, sbt_ref, sg_ref, sgt_ref, sgt2_ref,
                       *, n_valid, tile_rows, blocks_per_split, mask_rows):
    """One (tile_rows, C) block: accumulate 5 unweighted per-class sums.

    sb = sum(bce), sbt = sum(bce*t), sg = sum(g), sgt = sum(g*t),
    sgt2 = sum(g*t*t), with g = |sigmoid(pred) - t|.  The per-class pos/neg
    weights factor out of these sums and are applied once in the wrapper.
    """
    b = pl.program_id(1)

    @pl.when(b == 0)
    def _init():
        sb_ref[...] = jnp.zeros_like(sb_ref)
        sbt_ref[...] = jnp.zeros_like(sbt_ref)
        sg_ref[...] = jnp.zeros_like(sg_ref)
        sgt_ref[...] = jnp.zeros_like(sgt_ref)
        sgt2_ref[...] = jnp.zeros_like(sgt2_ref)

    pred = pred_ref[...].astype(jnp.float32)      # (T, C)
    target = target_ref[...].astype(jnp.float32)  # (T, C)

    if mask_rows:
        # Ragged tail / phantom blocks: rows >= n_valid get pred = -100 and
        # t = 0 so every accumulated term is (numerically) zero; this replaces
        # the wrapper-side jnp.pad of the whole (N, C) tensors.
        row0 = (pl.program_id(0) * blocks_per_split + b) * tile_rows
        rows = lax.broadcasted_iota(jnp.int32, pred.shape, 0) + row0
        valid = rows < n_valid
        pred = jnp.where(valid, pred, -100.0)
        target = jnp.where(valid, target, 0.0)

    # Shared exp(-|pred|) for the BCE-with-logits softplus term.
    e = jnp.exp(-jnp.abs(pred))
    bce = jnp.maximum(pred, 0.0) - pred * target + jnp.log1p(e)
    # sigmoid via tanh: keeps the divide off the VALU (EUP slot) with full f32
    # accuracy (cheaper than an approx-reciprocal Newton divide).
    prob = 0.5 * jnp.tanh(0.5 * pred) + 0.5
    g = jnp.abs(prob - target)                    # == |t*(p-1) + (1-t)*p|
    gt = g * target

    # Per-class partial sums (sublane reduce only; cross-split / weighting in
    # the wrapper).
    sb_ref[...] += jnp.sum(bce, axis=0, keepdims=True)
    sbt_ref[...] += jnp.sum(bce * target, axis=0, keepdims=True)
    sg_ref[...] += jnp.sum(g, axis=0, keepdims=True)
    sgt_ref[...] += jnp.sum(gt, axis=0, keepdims=True)
    sgt2_ref[...] += jnp.sum(gt * target, axis=0, keepdims=True)


def eqlv2_forward_pallas(pred, target, neg_w, w_diff, *,
                         block_rows=None, force_two_splits=False):
    """One EQLv2 forward step.

    weight = neg_w + w_diff * target (per class).  Returns
    (scalar loss, pos_grad (C,), neg_grad (C,)).
    """
    n_i, n_c = pred.shape
    multi_tc, block_budget, vmem_limit = _chip_config()

    granule = max(_sublane_granule(pred.dtype), _sublane_granule(target.dtype))
    c_lanes = _round_up(n_c, 128)  # lane-padded VMEM row width (f32 working set)

    if block_rows is not None:
        tile_rows = max(granule, _round_up(int(block_rows), granule))
    else:
        # Byte-budget tile sizing: per-input block ~2 MiB (v7x) / 4 MiB (else).
        tile_rows = max(granule, block_budget // (c_lanes * 4) // granule * granule)
        tile_rows = min(tile_rows, 8192)

    if n_i <= tile_rows:
        # Single row block covering the whole array: a full-dim block needs no
        # 8/16/32-row alignment and no masking.
        tile_rows = n_i
        p_splits = 1
        blocks_per_split = 1
        mask_rows = False
        row_map = lambda p, b: (0, 0)
    else:
        n_row_blocks = -(-n_i // tile_rows)
        use_two = (multi_tc or force_two_splits) and n_row_blocks >= 2
        p_splits = 2 if use_two else 1
        blocks_per_split = -(-n_row_blocks // p_splits)
        covered = p_splits * blocks_per_split * tile_rows
        mask_rows = covered > n_i
        last_blk = n_row_blocks - 1
        if p_splits * blocks_per_split > n_row_blocks:
            # Phantom blocks from rounding the TC split: clamp to the last real
            # block; their contribution is fully masked (row0 >= n_i).
            row_map = lambda p, b: (jnp.minimum(p * blocks_per_split + b,
                                                last_blk), 0)
        else:
            row_map = lambda p, b: (p * blocks_per_split + b, 0)

    kernel = functools.partial(
        _eqlv2_sums_kernel,
        n_valid=n_i, tile_rows=tile_rows,
        blocks_per_split=blocks_per_split, mask_rows=mask_rows)

    acc_shape = jax.ShapeDtypeStruct((p_splits, 1, n_c), jnp.float32)
    acc_spec = pl.BlockSpec((None, 1, n_c), lambda p, b: (p, 0, 0))

    # TODO(synk): if the "parallel" leading axis does not shard across the two
    # v7x TensorCores in practice, switch it to pltpu.CORE_PARALLEL.
    compiler_kwargs = dict(dimension_semantics=("parallel", "arbitrary"))
    if vmem_limit is not None:
        compiler_kwargs["vmem_limit_bytes"] = vmem_limit

    in_bytes = n_i * n_c * (jnp.dtype(pred.dtype).itemsize
                            + jnp.dtype(target.dtype).itemsize)
    out_bytes = 5 * p_splits * n_c * 4

    sums = pl.pallas_call(
        kernel,
        out_shape=(acc_shape,) * 5,
        grid=(p_splits, blocks_per_split),
        in_specs=[
            pl.BlockSpec((tile_rows, n_c), row_map),
            pl.BlockSpec((tile_rows, n_c), row_map),
        ],
        out_specs=(acc_spec,) * 5,
        compiler_params=pltpu.CompilerParams(**compiler_kwargs),
        cost_estimate=pl.CostEstimate(
            flops=20 * n_i * n_c,
            transcendentals=3 * n_i * n_c,      # exp, log1p, tanh per element
            bytes_accessed=in_bytes + out_bytes,
        ),
    )(pred, target)

    s_bce, s_bce_t, s_g, s_gt, s_gt2 = [jnp.sum(s, axis=(0, 1)) for s in sums]

    neg_w = neg_w.astype(jnp.float32)
    w_diff = w_diff.astype(jnp.float32)
    # weight = neg_w + w_diff * t, so:
    #   sum(bce*w)       = neg_w*S_bce + w_diff*S_bce_t
    #   sum(g*t*w)       = neg_w*S_gt  + w_diff*S_gt2
    #   sum(g*(1-t)*w)   = neg_w*(S_g - S_gt) + w_diff*(S_gt - S_gt2)
    loss = jnp.sum(neg_w * s_bce + w_diff * s_bce_t) * jnp.float32(1.0 / n_i)
    pos_grad = neg_w * s_gt + w_diff * s_gt2
    neg_grad = neg_w * (s_g - s_gt) + w_diff * (s_gt - s_gt2)
    return loss, pos_grad, neg_grad


@functools.partial(jax.jit,
                   static_argnames=("first", "block_rows", "force_two_splits"))
def _eqlv2_step(pred, target, pos_grad, neg_grad, pos_neg, *,
                first, block_rows=None, force_two_splits=False):
    """Whole forward step (weights + kernel + finalize + state update), jitted."""
    n_c = pred.shape[1]
    if first:
        neg_w = jnp.ones((n_c,), jnp.float32)
        w_diff = jnp.zeros((n_c,), jnp.float32)
    else:
        neg_w = jax.nn.sigmoid(GAMMA * (pos_neg.astype(jnp.float32) - MU))
        pos_w = 1.0 + ALPHA * (1.0 - neg_w)
        w_diff = pos_w - neg_w
    loss, pg, ng = eqlv2_forward_pallas(
        pred, target, neg_w, w_diff,
        block_rows=block_rows, force_two_splits=force_two_splits)
    pos_grad = pos_grad + pg
    neg_grad = neg_grad + ng
    pos_neg_new = pos_grad / (neg_grad + 1e-10)
    return loss, pos_grad, neg_grad, pos_neg_new


class EQLv2Pallas:
    """Stateful wrapper mirroring the PyTorch nn.Module's persistent buffers."""
    # TODO(synk): the persistent buffers (_pos_grad/_neg_grad/pos_neg) are
    # host-side Python state, matching the nn.Module; thread them functionally
    # if the whole training step gets jitted/scanned.

    def __init__(self, num_classes=5, block_rows=None, force_two_splits=False):
        self.gamma = GAMMA
        self.mu = MU
        self.alpha = ALPHA
        self.num_classes = num_classes
        self.block_rows = block_rows
        self.force_two_splits = force_two_splits
        self._pos_grad = None
        self._neg_grad = None
        self.pos_neg = None
        self.last_pos_neg = 1
        self.pre_pos_neg = 1

    def __call__(self, pred, target):
        n_i, n_c = pred.shape
        first = self._pos_grad is None
        if first:
            self._pos_grad = jnp.zeros((n_c,), jnp.float32)
            self._neg_grad = jnp.zeros((n_c,), jnp.float32)
            pos_neg = jnp.zeros((n_c,), jnp.float32)
        else:
            pos_neg = self.pos_neg
        loss, self._pos_grad, self._neg_grad, new_pos_neg = _eqlv2_step(
            pred, target, self._pos_grad, self._neg_grad, pos_neg,
            first=first, block_rows=self.block_rows,
            force_two_splits=self.force_two_splits)
        self.last_pos_neg = self.pre_pos_neg
        self.pre_pos_neg = self.pos_neg
        self.pos_neg = new_pos_neg
        return loss


def _reference_step(pred, target, pos_grad, neg_grad, pos_neg, first):
    """Pure-JAX reference of one EQLv2.forward step (loss + state update)."""
    n_i, n_c = pred.shape
    if first:
        neg_w = jnp.ones((n_c,), jnp.float32)
        pos_w = jnp.ones((n_c,), jnp.float32)
    else:
        neg_w = 1.0 / (1.0 + jnp.exp(-GAMMA * (pos_neg - MU)))
        pos_w = 1.0 + ALPHA * (1.0 - neg_w)
    weight = pos_w[None, :] * target + neg_w[None, :] * (1.0 - target)
    bce = (jnp.maximum(pred, 0.0) - pred * target
           + jnp.log1p(jnp.exp(-jnp.abs(pred))))
    loss = jnp.sum(bce * weight) / n_i
    prob = jax.nn.sigmoid(pred)
    grad = jnp.abs(target * (prob - 1.0) + (1.0 - target) * prob)
    pos_grad = pos_grad + jnp.sum(grad * target * weight, axis=0)
    neg_grad = neg_grad + jnp.sum(grad * (1.0 - target) * weight, axis=0)
    pos_neg = pos_grad / (neg_grad + 1e-10)
    return loss, pos_grad, neg_grad, pos_neg


if __name__ == "__main__":
    key = jax.random.PRNGKey(0)
    k1, k2, k3, k4, k5, k6 = jax.random.split(key, 6)

    # --- Test 1: module-default small shape, single full-N block -----------
    num_classes = 5
    n_i = 8
    pred = jax.random.normal(k1, (n_i, num_classes), dtype=jnp.float32)
    target = jax.random.bernoulli(k2, 0.3, (n_i, num_classes)).astype(jnp.float32)

    module = EQLv2Pallas(num_classes=num_classes)
    rpos = jnp.zeros((num_classes,), jnp.float32)
    rneg = jnp.zeros((num_classes,), jnp.float32)
    rpn = None

    loss1 = module(pred, target)
    jax.block_until_ready(loss1)
    ref1, rpos, rneg, rpn = _reference_step(pred, target, rpos, rneg, rpn, True)
    assert jnp.allclose(loss1, ref1, atol=2e-4, rtol=2e-4), (loss1, ref1)
    assert jnp.allclose(module.pos_neg, rpn, atol=3e-4, rtol=3e-4)

    loss2 = module(pred, target)  # exercises the map_func reweighting path
    jax.block_until_ready(loss2)
    ref2, rpos, rneg, rpn = _reference_step(pred, target, rpos, rneg, rpn, False)
    assert jnp.allclose(loss2, ref2, atol=5e-4, rtol=5e-4), (loss2, ref2)
    assert jnp.allclose(module.pos_neg, rpn, atol=3e-4, rtol=3e-4)

    # --- Test 2: tiled grid with ragged last block (in-kernel row masking),
    #             forced 2-way split -> exercises the phantom-block clamp ----
    n_i2, n_c2 = 39, 5
    pred2 = jax.random.normal(k3, (n_i2, n_c2), dtype=jnp.float32)
    target2 = jax.random.bernoulli(k4, 0.3, (n_i2, n_c2)).astype(jnp.float32)
    module2 = EQLv2Pallas(num_classes=n_c2, block_rows=8, force_two_splits=True)
    rpos2 = jnp.zeros((n_c2,), jnp.float32)
    rneg2 = jnp.zeros((n_c2,), jnp.float32)
    rpn2 = None
    for step, first in ((0, True), (1, False)):
        l = module2(pred2, target2)
        jax.block_until_ready(l)
        rl, rpos2, rneg2, rpn2 = _reference_step(
            pred2, target2, rpos2, rneg2, rpn2, first)
        assert jnp.allclose(l, rl, atol=5e-4, rtol=5e-4), (step, l, rl)
        assert jnp.allclose(module2.pos_neg, rpn2, atol=3e-4, rtol=3e-4)

    # --- Test 3: bf16 logits (16-row sublane granule), ragged N ------------
    n_i3, n_c3 = 50, 7
    pred3 = jax.random.normal(k5, (n_i3, n_c3), dtype=jnp.bfloat16)
    target3 = jax.random.bernoulli(k6, 0.3, (n_i3, n_c3)).astype(jnp.float32)
    module3 = EQLv2Pallas(num_classes=n_c3, block_rows=16)
    rl3, rpos3, rneg3, rpn3 = _reference_step(
        pred3.astype(jnp.float32), target3,
        jnp.zeros((n_c3,), jnp.float32), jnp.zeros((n_c3,), jnp.float32),
        None, True)
    l3 = module3(pred3, target3)
    jax.block_until_ready(l3)
    assert jnp.allclose(l3, rl3, atol=5e-4, rtol=5e-4), (l3, rl3)
    assert jnp.allclose(module3.pos_neg, rpn3, atol=1e-3, rtol=1e-3)

    print("KERNEL_OK")
</pallas_src>

<mosaic_0001>
module attributes {stable_mosaic.version = 11 : i64} {
  func.func @_eqlv2_sums_kernel(%arg0: i32, %arg1: i32, %arg2: memref<8x5xf32, #tpu.memory_space<vmem>>, %arg3: memref<8x5xf32, #tpu.memory_space<vmem>>, %arg4: memref<1x1x5xf32, #tpu.memory_space<vmem>>, %arg5: memref<1x1x5xf32, #tpu.memory_space<vmem>>, %arg6: memref<1x1x5xf32, #tpu.memory_space<vmem>>, %arg7: memref<1x1x5xf32, #tpu.memory_space<vmem>>, %arg8: memref<1x1x5xf32, #tpu.memory_space<vmem>>) attributes {dimension_semantics = [#tpu.dimension_semantics<parallel>, #tpu.dimension_semantics<arbitrary>], iteration_bounds = array<i64: 1, 1>, scalar_prefetch = 0 : i64, scratch_operands = 0 : i64, tpu.core_type = #tpu.core_type<tc>, window_params = [{pipeline_mode = #tpu.pipeline_mode<synchronous>, transform_indices = @transform_0, window_bounds = array<i64: 8, 5>}, {pipeline_mode = #tpu.pipeline_mode<synchronous>, transform_indices = @transform_1, window_bounds = array<i64: 8, 5>}, {transform_indices = @transform_2, window_bounds = array<i64: 1, 1, 5>}, {transform_indices = @transform_3, window_bounds = array<i64: 1, 1, 5>}, {transform_indices = @transform_4, window_bounds = array<i64: 1, 1, 5>}, {transform_indices = @transform_5, window_bounds = array<i64: 1, 1, 5>}, {transform_indices = @transform_6, window_bounds = array<i64: 1, 1, 5>}]} {
    %c0_i32 = arith.constant 0 : i32
    %0 = arith.cmpi eq, %arg1, %c0_i32 : i32
    %1 = arith.extui %0 : i1 to i32
    %c0_i32_0 = arith.constant 0 : i32
    %2 = arith.cmpi ne, %1, %c0_i32_0 : i32
    scf.if %2 {
      %cst_43 = arith.constant 0.000000e+00 : f32
      %67 = vector.broadcast %cst_43 : f32 to vector<1x5xf32>
      %c0_44 = arith.constant 0 : index
      %c0_45 = arith.constant 0 : index
      %c0_46 = arith.constant 0 : index
      %68 = vector.load %arg4[%c0_44, %c0_45, %c0_46] : memref<1x1x5xf32, #tpu.memory_space<vmem>>, vector<1x1x5xf32>
      %69 = vector.shape_cast %68 : vector<1x1x5xf32> to vector<1x5xf32>
      %70 = vector.shape_cast %67 : vector<1x5xf32> to vector<1x1x5xf32>
      tpu.vector_store %arg4[%c0_44, %c0_45, %c0_46], %70 {strides = array<i32>} : memref<1x1x5xf32, #tpu.memory_space<vmem>>, vector<1x1x5xf32>,
      %cst_47 = arith.constant 0.000000e+00 : f32
      %71 = vector.broadcast %cst_47 : f32 to vector<1x5xf32>
      %c0_48 = arith.constant 0 : index
      %c0_49 = arith.constant 0 : index
      %c0_50 = arith.constant 0 : index
      %72 = vector.load %arg5[%c0_48, %c0_49, %c0_50] : memref<1x1x5xf32, #tpu.memory_space<vmem>>, vector<1x1x5xf32>
      %73 = vector.shape_cast %72 : vector<1x1x5xf32> to vector<1x5xf32>
      %74 = vector.shape_cast %71 : vector<1x5xf32> to vector<1x1x5xf32>
      tpu.vector_store %arg5[%c0_48, %c0_49, %c0_50], %74 {strides = array<i32>} : memref<1x1x5xf32, #tpu.memory_space<vmem>>, vector<1x1x5xf32>,
      %cst_51 = arith.constant 0.000000e+00 : f32
      %75 = vector.broadcast %cst_51 : f32 to vector<1x5xf32>
      %c0_52 = arith.constant 0 : index
      %c0_53 = arith.constant 0 : index
      %c0_54 = arith.constant 0 : index
      %76 = vector.load %arg6[%c0_52, %c0_53, %c0_54] : memref<1x1x5xf32, #tpu.memory_space<vmem>>, vector<1x1x5xf32>
      %77 = vector.shape_cast %76 : vector<1x1x5xf32> to vector<1x5xf32>
      %78 = vector.shape_cast %75 : vector<1x5xf32> to vector<1x1x5xf32>
      tpu.vector_store %arg6[%c0_52, %c0_53, %c0_54], %78 {strides = array<i32>} : memref<1x1x5xf32, #tpu.memory_space<vmem>>, vector<1x1x5xf32>,
      %cst_55 = arith.constant 0.000000e+00 : f32
      %79 = vector.broadcast %cst_55 : f32 to vector<1x5xf32>
      %c0_56 = arith.constant 0 : index
      %c0_57 = arith.constant 0 : index
      %c0_58 = arith.constant 0 : index
      %80 = vector.load %arg7[%c0_56, %c0_57, %c0_58] : memref<1x1x5xf32, #tpu.memory_space<vmem>>, vector<1x1x5xf32>
      %81 = vector.shape_cast %80 : vector<1x1x5xf32> to vector<1x5xf32>
      %82 = vector.shape_cast %79 : vector<1x5xf32> to vector<1x1x5xf32>
      tpu.vector_store %arg7[%c0_56, %c0_57, %c0_58], %82 {strides = array<i32>} : memref<1x1x5xf32, #tpu.memory_space<vmem>>, vector<1x1x5xf32>,
      %cst_59 = arith.constant 0.000000e+00 : f32
      %83 = vector.broadcast %cst_59 : f32 to vector<1x5xf32>
      %c0_60 = arith.constant 0 : index
      %c0_61 = arith.constant 0 : index
      %c0_62 = arith.constant 0 : index
      %84 = vector.load %arg8[%c0_60, %c0_61, %c0_62] : memref<1x1x5xf32, #tpu.memory_space<vmem>>, vector<1x1x5xf32>
      %85 = vector.shape_cast %84 : vector<1x1x5xf32> to vector<1x5xf32>
      %86 = vector.shape_cast %83 : vector<1x5xf32> to vector<1x1x5xf32>
      tpu.vector_store %arg8[%c0_60, %c0_61, %c0_62], %86 {strides = array<i32>} : memref<1x1x5xf32, #tpu.memory_space<vmem>>, vector<1x1x5xf32>,
    } else {
    }
    %c0 = arith.constant 0 : index
    %c0_1 = arith.constant 0 : index
    %3 = vector.load %arg2[%c0, %c0_1] : memref<8x5xf32, #tpu.memory_space<vmem>>, vector<8x5xf32>
    %c0_2 = arith.constant 0 : index
    %c0_3 = arith.constant 0 : index
    %4 = vector.load %arg3[%c0_2, %c0_3] : memref<8x5xf32, #tpu.memory_space<vmem>>, vector<8x5xf32>
    %5 = math.absf %3 : vector<8x5xf32>
    %cst = arith.constant 0.000000e+00 : f32
    %6 = vector.broadcast %cst : f32 to vector<8x5xf32>
    %7 = arith.subf %6, %5 : vector<8x5xf32>
    %8 = math.exp %7 : vector<8x5xf32>
    %cst_4 = arith.constant 0.000000e+00 : f32
    %9 = vector.broadcast %cst_4 : f32 to vector<8x5xf32>
    %10 = arith.maximumf %3, %9 : vector<8x5xf32>
    %11 = arith.mulf %3, %4 : vector<8x5xf32>
    %12 = arith.subf %10, %11 : vector<8x5xf32>
    %13 = math.log1p %8 : vector<8x5xf32>
    %14 = arith.addf %12, %13 : vector<8x5xf32>
    %cst_5 = arith.constant 5.000000e-01 : f32
    %15 = vector.broadcast %cst_5 : f32 to vector<8x5xf32>
    %16 = arith.mulf %15, %3 : vector<8x5xf32>
    %17 = math.tanh %16 : vector<8x5xf32>
    %cst_6 = arith.constant 5.000000e-01 : f32
    %18 = vector.broadcast %cst_6 : f32 to vector<8x5xf32>
    %19 = arith.mulf %18, %17 : vector<8x5xf32>
    %cst_7 = arith.constant 5.000000e-01 : f32
    %20 = vector.broadcast %cst_7 : f32 to vector<8x5xf32>
    %21 = arith.addf %19, %20 : vector<8x5xf32>
    %22 = arith.subf %21, %4 : vector<8x5xf32>
    %23 = math.absf %22 : vector<8x5xf32>
    %24 = arith.mulf %23, %4 : vector<8x5xf32>
    %c0_8 = arith.constant 0 : index
    %c0_9 = arith.constant 0 : index
    %c0_10 = arith.constant 0 : index
    %25 = vector.load %arg4[%c0_8, %c0_9, %c0_10] : memref<1x1x5xf32, #tpu.memory_space<vmem>>, vector<1x1x5xf32>
    %26 = vector.shape_cast %25 : vector<1x1x5xf32> to vector<1x5xf32>
    %cst_11 = arith.constant dense<0.000000e+00> : vector<5xf32>
    %27 = vector.multi_reduction <add>, %14, %cst_11 [0] : vector<8x5xf32> to vector<5xf32>
    %28 = vector.shape_cast %27 : vector<5xf32> to vector<1x5xf32>
    %29 = arith.addf %26, %28 : vector<1x5xf32>
    %c0_12 = arith.constant 0 : index
    %c0_13 = arith.constant 0 : index
    %c0_14 = arith.constant 0 : index
    %30 = vector.load %arg4[%c0_12, %c0_13, %c0_14] : memref<1x1x5xf32, #tpu.memory_space<vmem>>, vector<1x1x5xf32>
    %31 = vector.shape_cast %30 : vector<1x1x5xf32> to vector<1x5xf32>
    %32 = vector.shape_cast %29 : vector<1x5xf32> to vector<1x1x5xf32>
    tpu.vector_store %arg4[%c0_12, %c0_13, %c0_14], %32 {strides = array<i32>} : memref<1x1x5xf32, #tpu.memory_space<vmem>>, vector<1x1x5xf32>,
    %c0_15 = arith.constant 0 : index
    %c0_16 = arith.constant 0 : index
    %c0_17 = arith.constant 0 : index
    %33 = vector.load %arg5[%c0_15, %c0_16, %c0_17] : memref<1x1x5xf32, #tpu.memory_space<vmem>>, vector<1x1x5xf32>
    %34 = vector.shape_cast %33 : vector<1x1x5xf32> to vector<1x5xf32>
    %35 = arith.mulf %14, %4 : vector<8x5xf32>
    %cst_18 = arith.constant dense<0.000000e+00> : vector<5xf32>
    %36 = vector.multi_reduction <add>, %35, %cst_18 [0] : vector<8x5xf32> to vector<5xf32>
    %37 = vector.shape_cast %36 : vector<5xf32> to vector<1x5xf32>
    %38 = arith.addf %34, %37 : vector<1x5xf32>
    %c0_19 = arith.constant 0 : index
    %c0_20 = arith.constant 0 : index
    %c0_21 = arith.constant 0 : index
    %39 = vector.load %arg5[%c0_19, %c0_20, %c0_21] : memref<1x1x5xf32, #tpu.memory_space<vmem>>, vector<1x1x5xf32>
    %40 = vector.shape_cast %39 : vector<1x1x5xf32> to vector<1x5xf32>
    %41 = vector.shape_cast %38 : vector<1x5xf32> to vector<1x1x5xf32>
    tpu.vector_store %arg5[%c0_19, %c0_20, %c0_21], %41 {strides = array<i32>} : memref<1x1x5xf32, #tpu.memory_space<vmem>>, vector<1x1x5xf32>,
    %c0_22 = arith.constant 0 : index
    %c0_23 = arith.constant 0 : index
    %c0_24 = arith.constant 0 : index
    %42 = vector.load %arg6[%c0_22, %c0_23, %c0_24] : memref<1x1x5xf32, #tpu.memory_space<vmem>>, vector<1x1x5xf32>
    %43 = vector.shape_cast %42 : vector<1x1x5xf32> to vector<1x5xf32>
    %cst_25 = arith.constant dense<0.000000e+00> : vector<5xf32>
    %44 = vector.multi_reduction <add>, %23, %cst_25 [0] : vector<8x5xf32> to vector<5xf32>
    %45 = vector.shape_cast %44 : vector<5xf32> to vector<1x5xf32>
    %46 = arith.addf %43, %45 : vector<1x5xf32>
    %c0_26 = arith.constant 0 : index
    %c0_27 = arith.constant 0 : index
    %c0_28 = arith.constant 0 : index
    %47 = vector.load %arg6[%c0_26, %c0_27, %c0_28] : memref<1x1x5xf32, #tpu.memory_space<vmem>>, vector<1x1x5xf32>
    %48 = vector.shape_cast %47 : vector<1x1x5xf32> to vector<1x5xf32>
    %49 = vector.shape_cast %46 : vector<1x5xf32> to vector<1x1x5xf32>
    tpu.vector_store %arg6[%c0_26, %c0_27, %c0_28], %49 {strides = array<i32>} : memref<1x1x5xf32, #tpu.memory_space<vmem>>, vector<1x1x5xf32>,
    %c0_29 = arith.constant 0 : index
    %c0_30 = arith.constant 0 : index
    %c0_31 = arith.constant 0 : index
    %50 = vector.load %arg7[%c0_29, %c0_30, %c0_31] : memref<1x1x5xf32, #tpu.memory_space<vmem>>, vector<1x1x5xf32>
    %51 = vector.shape_cast %50 : vector<1x1x5xf32> to vector<1x5xf32>
    %cst_32 = arith.constant dense<0.000000e+00> : vector<5xf32>
    %52 = vector.multi_reduction <add>, %24, %cst_32 [0] : vector<8x5xf32> to vector<5xf32>
    %53 = vector.shape_cast %52 : vector<5xf32> to vector<1x5xf32>
    %54 = arith.addf %51, %53 : vector<1x5xf32>
    %c0_33 = arith.constant 0 : index
    %c0_34 = arith.constant 0 : index
    %c0_35 = arith.constant 0 : index
    %55 = vector.load %arg7[%c0_33, %c0_34, %c0_35] : memref<1x1x5xf32, #tpu.memory_space<vmem>>, vector<1x1x5xf32>
    %56 = vector.shape_cast %55 : vector<1x1x5xf32> to vector<1x5xf32>
    %57 = vector.shape_cast %54 : vector<1x5xf32> to vector<1x1x5xf32>
    tpu.vector_store %arg7[%c0_33, %c0_34, %c0_35], %57 {strides = array<i32>} : memref<1x1x5xf32, #tpu.memory_space<vmem>>, vector<1x1x5xf32>,
    %c0_36 = arith.constant 0 : index
    %c0_37 = arith.constant 0 : index
    %c0_38 = arith.constant 0 : index
    %58 = vector.load %arg8[%c0_36, %c0_37, %c0_38] : memref<1x1x5xf32, #tpu.memory_space<vmem>>, vector<1x1x5xf32>
    %59 = vector.shape_cast %58 : vector<1x1x5xf32> to vector<1x5xf32>
    %60 = arith.mulf %24, %4 : vector<8x5xf32>
    %cst_39 = arith.constant dense<0.000000e+00> : vector<5xf32>
    %61 = vector.multi_reduction <add>, %60, %cst_39 [0] : vector<8x5xf32> to vector<5xf32>
    %62 = vector.shape_cast %61 : vector<5xf32> to vector<1x5xf32>
    %63 = arith.addf %59, %62 : vector<1x5xf32>
    %c0_40 = arith.constant 0 : index
    %c0_41 = arith.constant 0 : index
    %c0_42 = arith.constant 0 : index
    %64 = vector.load %arg8[%c0_40, %c0_41, %c0_42] : memref<1x1x5xf32, #tpu.memory_space<vmem>>, vector<1x1x5xf32>
    %65 = vector.shape_cast %64 : vector<1x1x5xf32> to vector<1x5xf32>
    %66 = vector.shape_cast %63 : vector<1x5xf32> to vector<1x1x5xf32>
    tpu.vector_store %arg8[%c0_40, %c0_41, %c0_42], %66 {strides = array<i32>} : memref<1x1x5xf32, #tpu.memory_space<vmem>>, vector<1x1x5xf32>,
    return
  }
  func.func @transform_0(%arg0: i32, %arg1: i32) -> (i32, i32) {
    %c0_i32 = arith.constant 0 : i32
    %c0_i32_0 = arith.constant 0 : i32
    %c0_i32_1 = arith.constant 0 : i32
    return %c0_i32, %c0_i32_0 : i32, i32
  }
  func.func @transform_1(%arg0: i32, %arg1: i32) -> (i32, i32) {
    %c0_i32 = arith.constant 0 : i32
    %c0_i32_0 = arith.constant 0 : i32
    %c0_i32_1 = arith.constant 0 : i32
    return %c0_i32, %c0_i32_0 : i32, i32
  }
  func.func @transform_2(%arg0: i32, %arg1: i32) -> (i32, i32, i32) {
    %c0_i32 = arith.constant 0 : i32
    %c0_i32_0 = arith.constant 0 : i32
    %c0_i32_1 = arith.constant 0 : i32
    return %arg0, %c0_i32, %c0_i32_0 : i32, i32, i32
  }
  func.func @transform_3(%arg0: i32, %arg1: i32) -> (i32, i32, i32) {
    %c0_i32 = arith.constant 0 : i32
    %c0_i32_0 = arith.constant 0 : i32
    %c0_i32_1 = arith.constant 0 : i32
    return %arg0, %c0_i32, %c0_i32_0 : i32, i32, i32
  }
  func.func @transform_4(%arg0: i32, %arg1: i32) -> (i32, i32, i32) {
    %c0_i32 = arith.constant 0 : i32
    %c0_i32_0 = arith.constant 0 : i32
    %c0_i32_1 = arith.constant 0 : i32
    return %arg0, %c0_i32, %c0_i32_0 : i32, i32, i32
  }
  func.func @transform_5(%arg0: i32, %arg1: i32) -> (i32, i32, i32) {
    %c0_i32 = arith.constant 0 : i32
    %c0_i32_0 = arith.constant 0 : i32
    %c0_i32_1 = arith.constant 0 : i32
    return %arg0, %c0_i32, %c0_i32_0 : i32, i32, i32
  }
  func.func @transform_6(%arg0: i32, %arg1: i32) -> (i32, i32, i32) {
    %c0_i32 = arith.constant 0 : i32
    %c0_i32_0 = arith.constant 0 : i32
    %c0_i32_1 = arith.constant 0 : i32
    return %arg0, %c0_i32, %c0_i32_0 : i32, i32, i32
  }
}

</mosaic_0001>

<bundles_post_ra>
// kernel: _eqlv2_step.1
= control target key start
LH: loop header
LB: loop body
LE: loop exit
PB: predicated region body
PF: predicated region fallthrough
CT: control target
= control target key end

     0   :  { %12 = vsyncpa [#allocation3], 0  ;;  %s309_s0 = inlined_call_operand.hbm [shape: f32[8,5], index: 0, kind: input, shape index: {}]   ;;  %s310_s1 = inlined_call_operand.hbm [shape: f32[8,5], index: 1, kind: input, shape index: {}]   ;;  %s311_s2 = inlined_call_operand.vmem [shape: f32[1,1,5], index: 2, kind: output, shape index: {0}]   ;;  %s312_s3 = inlined_call_operand.vmem [shape: f32[1,1,5], index: 3, kind: output, shape index: {1}]   ;;  %s313_s4 = inlined_call_operand.vmem [shape: f32[1,1,5], index: 4, kind: output, shape index: {2}]   ;;  %s314_s5 = inlined_call_operand.vmem [shape: f32[1,1,5], index: 5, kind: output, shape index: {3}]   ;;  %s315_s6 = inlined_call_operand.vmem [shape: f32[1,1,5], index: 6, kind: output, shape index: {4}]  }
   0x1   :  { %13 = vsyncpa [#allocation5], 0  ;;  %s205_s21 = smov [#allocation2]   ;;  %s206_s23 = smov [#allocation4]  }
   0x2   :  { %s20_s22 = sshll.u32 %s205_s21, 4  ;;  %s30_s24 = sshll.u32 %s206_s23, 4  ;;  %s21_s22 = int_to_ptr.vmem [resolvable:$true] %s20_s22  ;;  %s31_s24 = int_to_ptr.vmem [resolvable:$true] %s30_s24 }
   0x3   :  { %s169_s25 = scalar_lea.vmem %s21_s22, 128  ;;  %p174_p1 = scmp.lt.s32.totalorder %s21_s22, %s21_s22 }
   0x4   :  { %p170_p0 = scmp.ne.s32.totalorder %s21_s22, %s169_s25  ;;  %p175_p2 = scmp.lt.s32.totalorder %s169_s25, %s169_s25 }
   0x6   :  { %p176_p3 = por %p175_p2, %p174_p1 }
   0x8   :  { %p177_p4 = pnand %p176_p3, %p170_p0 }
   0xa   :  { %180 = shalt.err (!%p177_p4)
}
   0xb   :  { %23 = dma.hbm_to_vmem [thread:$0]  %s309_s0, 128, %s21_s22, [#allocation3]  }
   0xc   :  { %s189_s28 = scalar_lea.vmem %s31_s24, 128  ;;  %p194_p6 = scmp.lt.s32.totalorder %s31_s24, %s31_s24 }
   0xd   :  { %p190_p5 = scmp.ne.s32.totalorder %s31_s24, %s189_s28  ;;  %p195_p7 = scmp.lt.s32.totalorder %s189_s28, %s189_s28 }
   0xf   :  { %p196_p8 = por %p195_p7, %p194_p6 }
  0x11   :  { %p197_p9 = pnand %p196_p8, %p190_p5 }
  0x13   :  { %200 = shalt.err (!%p197_p9)
}
  0x14   :  { %33 = dma.hbm_to_vmem [thread:$0]  %s310_s1, 128, %s31_s24, [#allocation5]  }
  0x15   :  { %201 = dma.done.wait [#allocation3], 128  }
  0x16   :  { %202 = vsyncadd [#allocation3], 4294967168 }
  0x17   :  { %203 = dma.done.wait [#allocation5], 128  }
  0x18   :  { %204 = vsyncadd [#allocation5], 4294967168  ;;  %vm44_vm0 = vcmask 32768   ;;  %v207_v0 = vmov 0.0   ;;  %v50_v1 = vld [vmem:[#allocation2] sm:$0xff]  ;;  %v51_v8 = vld [vmem:[#allocation4] sm:$0xff] }
  0x19   :  { %45 = vst.msk [vmem:[%s311_s2] sm:$0x1] %vm44_vm0, %v207_v0  ;;  %46 = vst.msk [vmem:[%s312_s3] sm:$0x1] %vm44_vm0, %v207_v0  ;;  %v52_v2 = vand.u32 2147483647, %v50_v1  ;;  %v57_v27 = vmul.f32 %v51_v8, %v50_v1 }
  0x1a   :  { %47 = vst.msk [vmem:[%s313_s4] sm:$0x1] %vm44_vm0, %v207_v0  ;;  %48 = vst.msk [vmem:[%s314_s5] sm:$0x1] %vm44_vm0, %v207_v0  ;;  %v69_v3 = vmul.f32 0.5, %v50_v1  ;;  %vm77_vm1 = vcmask 39936  }
  0x1b   :  { %49 = vst.msk [vmem:[%s315_s6] sm:$0x1] %vm44_vm0, %v207_v0  ;;  %v53_v4 = vsub.f32 0.0, %v52_v2  ;;  %v56_v26 = vmax.f32 %v50_v1, 0.0 }
  0x1c   :  { %155 = vtanh.f32 %v69_v3 }
  0x1d   :  { %v54_v5 = vmul.f32 1.442695, %v53_v4  ;;  %v58_v36 = vsub.f32 %v56_v26, %v57_v27 }
  0x1f   :  { %157 = vpow2.f32 %v54_v5 }
  0x20   :  { %v76_v2 = vld [vmem:[%s311_s2] sm:$0x1] }
  0x21   :  { %v99_v38 = vld [vmem:[%s313_s4] sm:$0x1] }
  0x22   :  { %v109_v44 = vld [vmem:[%s314_s5] sm:$0x1] }
  0x23   :  { %v119_v49 = vld [vmem:[%s315_s6] sm:$0x1] }
  0x24   :  { %v88_v5 = vld [vmem:[%s312_s3] sm:$0x1] }
  0x29   :  { %v156_v6 = vpop.eup %155 }
  0x2a   :  { %v71_v7 = vmul.f32 0.5, %v156_v6 }
  0x2c   :  { %v72_v9 = vadd.f32 0.5, %v71_v7  ;;  %v158_v10 = vpop.eup %157 }
  0x2d   :  { %v59_v11 = vadd.f32 1.0, %v158_v10  ;;  %v62_v17 = vmul.f32 -0.5, %v158_v10  ;;  %v65_v29 = vand.u32 2147483647, %v158_v10 }
  0x2e   :  { %v73_v12 = vsub.f32 %v72_v9, %v51_v8 }
  0x2f   :  { %159 = vlog2.f32 %v59_v11  ;;  %v63_v28 = vadd.f32 1.0, %v62_v17  ;;  %vm66_vm2 = vcmp.lt.f32.partialorder %v65_v29, 0.0004427343 }
  0x30   :  { %v74_v13 = vand.u32 2147483647, %v73_v12 }
  0x31   :  { %v64_v37 = vmul.f32 %v158_v10, %v63_v28 }
  0x32   :  { %v100_v14 = vsel %vm77_vm1, %v74_v13, 0.0  ;;  %v75_v15 = vmul.f32 %v74_v13, %v51_v8 }
  0x33   :  { %v101_v16 = vrot.slane %v100_v14, 4 }
  0x34   :  { %v110_v18 = vsel %vm77_vm1, %v75_v15, 0.0  ;;  %v120_v19 = vmul.f32 %v75_v15, %v51_v8 }
  0x35   :  { %v102_v20 = vadd.f32 %v101_v16, %v100_v14  ;;  %v111_v21 = vrot.slane %v110_v18, 4 }
  0x36   :  { %v121_v22 = vsel %vm77_vm1, %v120_v19, 0.0 }
  0x37   :  { %v103_v23 = vrot.slane %v102_v20, 2  ;;  %v112_v24 = vadd.f32 %v111_v21, %v110_v18  ;;  %v122_v25 = vrot.slane %v121_v22, 4 }
  0x39   :  { %v104_v30 = vadd.f32 %v103_v23, %v102_v20  ;;  %v113_v31 = vrot.slane %v112_v24, 2  ;;  %v123_v32 = vadd.f32 %v122_v25, %v121_v22 }
  0x3b   :  { %v105_v33 = vrot.slane %v104_v30, 1  ;;  %v114_v34 = vadd.f32 %v113_v31, %v112_v24  ;;  %v124_v35 = vrot.slane %v123_v32, 2 }
  0x3c   :  { %v160_v39 = vpop.eup %159 }
  0x3d   :  { %v106_v40 = vadd.f32 %v105_v33, %v104_v30  ;;  %v115_v41 = vrot.slane %v114_v34, 1  ;;  %v125_v42 = vadd.f32 %v124_v35, %v123_v32  ;;  %v61_v43 = vmul.f32 0.6931472, %v160_v39 }
  0x3f   :  { %v107_v45 = vadd.f32 %v106_v40, %v99_v38  ;;  %v116_v46 = vadd.f32 %v115_v41, %v114_v34  ;;  %v126_v47 = vrot.slane %v125_v42, 1  ;;  %v67_v48 = vsel %vm66_vm2, %v64_v37, %v61_v43 }
  0x40   :  { %v68_v50 = vadd.f32 %v67_v48, %v58_v36 }
  0x41   :  { %108 = vst.msk [vmem:[%s313_s4] sm:$0x1] %vm44_vm0, %v107_v45  ;;  %v117_v51 = vadd.f32 %v116_v46, %v109_v44  ;;  %v127_v52 = vadd.f32 %v126_v47, %v125_v42 }
  0x42   :  { %v78_v53 = vsel %vm77_vm1, %v68_v50, 0.0  ;;  %v89_v54 = vmul.f32 %v68_v50, %v51_v8 }
  0x43   :  { %118 = vst.msk [vmem:[%s314_s5] sm:$0x1] %vm44_vm0, %v117_v51  ;;  %v128_v55 = vadd.f32 %v127_v52, %v119_v49  ;;  %v79_v56 = vrot.slane %v78_v53, 4 }
  0x44   :  { %v90_v57 = vsel %vm77_vm1, %v89_v54, 0.0 }
  0x45   :  { %129 = vst.msk [vmem:[%s315_s6] sm:$0x1] %vm44_vm0, %v128_v55  ;;  %v80_v58 = vadd.f32 %v79_v56, %v78_v53  ;;  %v91_v59 = vrot.slane %v90_v57, 4 }
  0x47   :  { %v81_v60 = vrot.slane %v80_v58, 2  ;;  %v92_v61 = vadd.f32 %v91_v59, %v90_v57 }
  0x49   :  { %v82_v62 = vadd.f32 %v81_v60, %v80_v58  ;;  %v93_v63 = vrot.slane %v92_v61, 2 }
  0x4b   :  { %v83_v0 = vrot.slane %v82_v62, 1  ;;  %v94_v1 = vadd.f32 %v93_v63, %v92_v61 }
  0x4d   :  { %v84_v3 = vadd.f32 %v83_v0, %v82_v62  ;;  %v95_v4 = vrot.slane %v94_v1, 1 }
  0x4f   :  { %v85_v6 = vadd.f32 %v84_v3, %v76_v2  ;;  %v96_v7 = vadd.f32 %v95_v4, %v94_v1 }
  0x51   :  { %87 = vst.msk [vmem:[%s311_s2] sm:$0x1] %vm44_vm0, %v85_v6  ;;  %v97_v8 = vadd.f32 %v96_v7, %v88_v5 }
  0x53   :  { %98 = vst.msk [vmem:[%s312_s3] sm:$0x1] %vm44_vm0, %v97_v8 }
  0x54   :  { %150 = vsyncpa [#allocation3], 1 }
  0x55   :  { %151 = vsyncpa [#allocation5], 1 }

</bundles_post_ra>
